<compile_context>
chip_gen: v7x
topology: tpu7x:2x2x1
jax: 0.10.0
libtpu: 0.0.40
codegen_flags: <defaults>
</compile_context>

<pallas_src>
import functools

import jax
import jax.numpy as jnp
from jax import lax
from jax.experimental import pallas as pl
from jax.experimental.pallas import tpu as pltpu


def _max_identity(dtype):
    dtype = jnp.dtype(dtype)
    if jnp.issubdtype(dtype, jnp.floating):
        return float("-inf")
    if jnp.issubdtype(dtype, jnp.integer):
        return int(jnp.iinfo(dtype).min)
    if dtype == jnp.bool_:
        return False
    raise ValueError(f"unsupported dtype for max pooling: {dtype}")


def _roll_ok(a, axis):
    """pltpu.roll (lane/sublane rotate) wants the last-two dims tile-aligned."""
    if a.ndim < 2 or axis < a.ndim - 2:
        return False
    packing = max(1, 4 // jnp.dtype(a.dtype).itemsize)
    return (a.shape[-1] % 128 == 0) and (a.shape[-2] % (8 * packing) == 0)


def _shifted_tap(a, off, axis, neg):
    """tap[..., i, ...] = a[..., i + off, ...] along `axis`; out-of-range -> neg."""
    if off == 0:
        return a
    n = a.shape[axis]
    if abs(off) >= n:
        return jnp.full(a.shape, neg, a.dtype)
    if _roll_ok(a, axis):
        # Fast path: XLU rotate + VPU select -> no extra block-sized VMEM copies and no
        # store-slot pressure from concatenation.
        rolled = pltpu.roll(a, (-off) % n, axis)
        iota_shape = (1,) * (a.ndim - 2) + a.shape[-2:]
        idx = lax.broadcasted_iota(jnp.int32, iota_shape, axis)
        valid = (idx + off >= 0) & (idx + off < n)
        return jnp.where(valid, rolled, jnp.asarray(neg, dtype=a.dtype))
    # Fallback for tiles that are not (8,128)-aligned: slice + fill + concat.
    fill_shape = list(a.shape)
    fill_shape[axis] = abs(off)
    fill = jnp.full(tuple(fill_shape), neg, a.dtype)
    if off > 0:
        body = lax.slice_in_dim(a, off, n, axis=axis)
        return jnp.concatenate([body, fill], axis=axis)
    body = lax.slice_in_dim(a, 0, n + off, axis=axis)
    return jnp.concatenate([fill, body], axis=axis)


def _maxpool_kernel(x_ref, o_ref, *, k, s, d, pad, neg):
    # x_ref: (bc, H, W) native-NCHW block; o_ref: (bc, Ho, Wo).
    x = x_ref[...]
    bc, h, w = x.shape
    ho, wo = o_ref.shape[1], o_ref.shape[2]

    # Pass 1: max over the k taps along W (lane axis).
    m1 = None
    for kj in range(k):
        t = _shifted_tap(x, kj * d - pad, 2, neg)
        m1 = t if m1 is None else jnp.maximum(m1, t)

    # For strided pooling keep only the needed output columns before the H pass.
    if s != 1:
        m1 = lax.slice(m1, (0, 0, 0), (bc, h, (wo - 1) * s + 1), (1, 1, s))

    # Pass 2: max over the k taps along H (sublane axis).
    out = None
    for ki in range(k):
        t = _shifted_tap(m1, ki * d - pad, 1, neg)
        out = t if out is None else jnp.maximum(out, t)

    if s != 1:
        out = lax.slice(out, (0, 0, 0), (bc, (ho - 1) * s + 1, out.shape[2]), (1, s, 1))

    o_ref[...] = out.astype(o_ref.dtype)


def maxpool2d(x, kernel_size=3, stride=1, dilation=1):
    """x: (N, C, H, W). Matches torch.nn.MaxPool2d(k, stride, (k-1)//2*d, d)."""
    n, c, h, w = x.shape
    k, s, d = kernel_size, stride, dilation
    pad = (k - 1) // 2 * d
    ho = (h + 2 * pad - d * (k - 1) - 1) // s + 1
    wo = (w + 2 * pad - d * (k - 1) - 1) // s + 1
    nc = n * c

    # Native layout: merge (N, C) -> NC. Pure reshape (contiguous), no transpose,
    # no extra HBM pass.
    x3 = x.reshape(nc, h, w)

    # Per-generation VMEM budget (v7x has only 64 MiB/TC; v5e/v6e have 128 MiB).
    try:
        vmem_cap = int(pltpu.get_tpu_info().vmem_capacity_bytes)
    except Exception:
        vmem_cap = 64 * 1024 * 1024
    if vmem_cap >= 100 * 1024 * 1024:        # v5e / v6e
        budget = 8 * 1024 * 1024             # bytes for one (in + out) block
        vmem_limit = 80 * 1024 * 1024
    else:                                     # v7x (or unknown): conservative
        budget = 4 * 1024 * 1024
        vmem_limit = 48 * 1024 * 1024

    itemsize = jnp.dtype(x.dtype).itemsize
    per_ch = (h * w + ho * wo) * itemsize     # in + out bytes per (N*C) plane
    bc = max(1, min(nc, budget // per_ch))
    if nc >= 2:
        bc = min(bc, (nc + 1) // 2)           # >= 2 grid steps so megacore can shard
    grid0 = pl.cdiv(nc, bc)                   # ragged last block OK: channels independent
    # TODO(synk): if a single (H, W) plane exceeds the budget (bc == 1 and huge H*W),
    # an H-blocked variant with halo rows (manual make_async_copy) would be needed.

    neg = _max_identity(x.dtype)
    kernel = functools.partial(_maxpool_kernel, k=k, s=s, d=d, pad=pad, neg=neg)

    out3 = pl.pallas_call(
        kernel,
        out_shape=jax.ShapeDtypeStruct((nc, ho, wo), x.dtype),
        grid_spec=pltpu.PrefetchScalarGridSpec(
            num_scalar_prefetch=0,
            grid=(grid0,),
            in_specs=[pl.BlockSpec((bc, h, w), lambda i: (i, 0, 0))],
            out_specs=pl.BlockSpec((bc, ho, wo), lambda i: (i, 0, 0)),
        ),
        compiler_params=pltpu.CompilerParams(
            dimension_semantics=("parallel",),
            vmem_limit_bytes=vmem_limit,
        ),
    )(x3)

    return out3.reshape(n, c, ho, wo)


def _reference(x, kernel_size=3, stride=1, dilation=1):
    pad = (kernel_size - 1) // 2 * dilation
    return lax.reduce_window(
        x,
        -jnp.inf,
        lax.max,
        window_dimensions=(1, 1, kernel_size, kernel_size),
        window_strides=(1, 1, stride, stride),
        padding=((0, 0), (0, 0), (pad, pad), (pad, pad)),
        window_dilation=(1, 1, dilation, dilation),
    )


if __name__ == "__main__":
    key = jax.random.PRNGKey(0)
    # MaxPool2d(inp=4, oup=4): channel args are metadata only. batch=2, spatial=16.
    x = jax.random.normal(key, (2, 4, 16, 16), dtype=jnp.float32)

    y = maxpool2d(x, kernel_size=3, dilation=1, stride=1)
    y = jax.block_until_ready(y)

    y_ref = _reference(x, kernel_size=3, dilation=1, stride=1)
    assert y.shape == y_ref.shape, (y.shape, y_ref.shape)
    assert jnp.allclose(y, y_ref), "mismatch vs lax.reduce_window reference"

    print("KERNEL_OK")
</pallas_src>

<mosaic_0001>
module attributes {stable_mosaic.version = 11 : i64} {
  func.func @_maxpool_kernel(%arg0: i32, %arg1: memref<4x16x16xf32, #tpu.memory_space<vmem>>, %arg2: memref<4x16x16xf32, #tpu.memory_space<vmem>>) attributes {dimension_semantics = [#tpu.dimension_semantics<parallel>], iteration_bounds = array<i64: 2>, scalar_prefetch = 0 : i64, scratch_operands = 0 : i64, tpu.core_type = #tpu.core_type<tc>, window_params = [{transform_indices = @transform_0, window_bounds = array<i64: 4, 16, 16>}, {transform_indices = @transform_1, window_bounds = array<i64: 4, 16, 16>}]} {
    %c0 = arith.constant 0 : index
    %c0_0 = arith.constant 0 : index
    %c0_1 = arith.constant 0 : index
    %0 = vector.load %arg1[%c0, %c0_0, %c0_1] : memref<4x16x16xf32, #tpu.memory_space<vmem>>, vector<4x16x16xf32>
    %cst = arith.constant 0xFF800000 : f32
    %1 = vector.broadcast %cst : f32 to vector<4x16x1xf32>
    %2 = vector.extract_strided_slice %0 {offsets = [0, 0, 0], sizes = [4, 16, 15], strides = [1, 1, 1]} : vector<4x16x16xf32> to vector<4x16x15xf32>
    %3 = tpu.concatenate %1, %2 in 2 : vector<4x16x1xf32>, vector<4x16x15xf32> -> vector<4x16x16xf32>
    %4 = arith.maximumf %3, %0 : vector<4x16x16xf32>
    %cst_2 = arith.constant 0xFF800000 : f32
    %5 = vector.broadcast %cst_2 : f32 to vector<4x16x1xf32>
    %6 = vector.extract_strided_slice %0 {offsets = [0, 0, 1], sizes = [4, 16, 15], strides = [1, 1, 1]} : vector<4x16x16xf32> to vector<4x16x15xf32>
    %7 = tpu.concatenate %6, %5 in 2 : vector<4x16x15xf32>, vector<4x16x1xf32> -> vector<4x16x16xf32>
    %8 = arith.maximumf %4, %7 : vector<4x16x16xf32>
    %cst_3 = arith.constant 0xFF800000 : f32
    %9 = vector.broadcast %cst_3 : f32 to vector<4x1x16xf32>
    %10 = vector.extract_strided_slice %8 {offsets = [0, 0, 0], sizes = [4, 15, 16], strides = [1, 1, 1]} : vector<4x16x16xf32> to vector<4x15x16xf32>
    %11 = tpu.concatenate %9, %10 in 1 : vector<4x1x16xf32>, vector<4x15x16xf32> -> vector<4x16x16xf32>
    %12 = arith.maximumf %11, %8 : vector<4x16x16xf32>
    %cst_4 = arith.constant 0xFF800000 : f32
    %13 = vector.broadcast %cst_4 : f32 to vector<4x1x16xf32>
    %14 = vector.extract_strided_slice %8 {offsets = [0, 1, 0], sizes = [4, 15, 16], strides = [1, 1, 1]} : vector<4x16x16xf32> to vector<4x15x16xf32>
    %15 = tpu.concatenate %14, %13 in 1 : vector<4x15x16xf32>, vector<4x1x16xf32> -> vector<4x16x16xf32>
    %16 = arith.maximumf %12, %15 : vector<4x16x16xf32>
    %c0_5 = arith.constant 0 : index
    %c0_6 = arith.constant 0 : index
    %c0_7 = arith.constant 0 : index
    %17 = vector.load %arg2[%c0_5, %c0_6, %c0_7] : memref<4x16x16xf32, #tpu.memory_space<vmem>>, vector<4x16x16xf32>
    tpu.vector_store %arg2[%c0_5, %c0_6, %c0_7], %16 {strides = array<i32>} : memref<4x16x16xf32, #tpu.memory_space<vmem>>, vector<4x16x16xf32>,
    return
  }
  func.func @transform_0(%arg0: i32) -> (i32, i32, i32) {
    %c0_i32 = arith.constant 0 : i32
    %c0_i32_0 = arith.constant 0 : i32
    %c0_i32_1 = arith.constant 0 : i32
    return %arg0, %c0_i32, %c0_i32_0 : i32, i32, i32
  }
  func.func @transform_1(%arg0: i32) -> (i32, i32, i32) {
    %c0_i32 = arith.constant 0 : i32
    %c0_i32_0 = arith.constant 0 : i32
    %c0_i32_1 = arith.constant 0 : i32
    return %arg0, %c0_i32, %c0_i32_0 : i32, i32, i32
  }
}

</mosaic_0001>

<bundles_post_ra>
// kernel: tpu_custom_call.1
= control target key start
LH: loop header
LB: loop body
LE: loop exit
PB: predicated region body
PF: predicated region fallthrough
CT: control target
= control target key end

     0   :  { %6 = vsyncpa [#allocation3], 0  ;;  %s842_s0 = inlined_call_operand.hbm [shape: f32[8,16,16], index: 0, kind: input, shape index: {}]   ;;  %s843_s1 = inlined_call_operand.hbm [shape: f32[8,16,16], index: 1, kind: output, shape index: {}]  }
   0x1   :  { %8 = vsyncpa [#allocation3 + $0x1], 0 }
   0x2   :  { %9 = vsyncpa [#allocation4], 0 }
   0x3   :  { %11 = vsyncpa [#allocation4 + $0x1], 0  ;;  %s595_s6 = smov 0   ;;  %s597_s7 = smov 0  }
   0x4   :  { %s599_s8 = smov 0   ;;  %s601_s9 = smov 0  }
   0x5 LB: > { %s616_s10 = sadd.s32 4294967295, %s575_s9   ;;  %s407_s11 = sadd.s32 4294967294, %s575_s9   ;;  %s575_s9 = sphi %s601_s9, %s856_s9   ;;  %s571_s8 = sphi %s599_s8, %s855_s8   ;;  %s567_s7 = sphi %s597_s7, %s854_s7   ;;  %s563_s6 = sphi %s595_s6, %s853_s6  }
   0x6   : > { %s620_s12 = sadd.s32 1, %s575_s9   ;;  %s24_s13 = sadd.s32 1, %s571_s8 }
   0x7   : > { %s21_s14 = ssub.s32 %s575_s9, %s620_s12  ;;  %p31_p0 = scmp.ne.s32.totalorder %s571_s8, %s567_s7 }
   0x8   : > { %p22_p1 = scmp.eq.s32.totalorder %s21_s14, 0  ;;  %p32_p2 = scmp.eq.s32.totalorder %s575_s9, 0 }
   0x9   : > { %p37_p3 = scmp.ne.s32.totalorder %s567_s7, %s563_s6  ;;  %p38_p4 = scmp.eq.s32.totalorder %s616_s10, 0 }
   0xa   : > { %s632_s15 = scalar_select %p22_p1, %s571_s8, %s24_s13  }
   0xb   : > { %p634_p5 = por %p32_p2, %p31_p0  ;;  %p638_p6 = por %p38_p4, %p37_p3 }
   0xc   : > { %p61_p7 = scmp.eq.s32.totalorder %s616_s10, 1  ;;  %p67_p8 = scmp.eq.s32.totalorder %s407_s11, 1 }
   0xd   : > { %p439_p10 = scmp.lt.s32.totalorder %s575_s9, 2  ;;  %s87_s20 = sand.u32 1, %s571_s8  }
   0xe   : > { %p645_p11 = por %p61_p7, %p31_p0  ;;  %p649_p12 = por %p67_p8, %p37_p3 }
   0xf   : > { %s424_s21 = sshll.u32 %s575_s9, 10  ;;  %s410_s22 = sshll.u32 %s87_s20, 6 }
  0x10   : > { %s847_s18 = scalar_select %p645_p11, 1, 0 }
  0x11   : > { %s848_s19 = scalar_select %p649_p12, 1, 0 }
  0x12   : > { %s658_s25 = scalar_lea.hbm %s842_s0, %s424_s21  ;;  %s91_s26 = scalar_lea.vmem [#allocation2], %s410_s22 }
  0x13   : > { %s99_s27 = sshll.u32 %s91_s26, 4  ;;  %p662_p13 = pnand %p439_p10, %p634_p5  ;;  %s666_s27 = int_to_ptr.vmem [resolvable:$true] %s99_s27 }
  0x14   : > { %s668_s29 = scalar_lea.sflag [#allocation3], %s87_s20  ;;  %s479_s30 = scalar_lea.hbm %s658_s25, 1024 }
  0x15   : > { %p480_p0 = scmp.ne.s32.totalorder %s658_s25, %s479_s30  ;;  %p481_p1 = pneg %p662_p13 }
  0x16   : > { %s484_s4 = scalar_lea.hbm %s842_s0, 2048  ;;  %p485_p4 = scmp.lt.u32.totalorder %s658_s25, %s842_s0 }
  0x17   : > { %p482_p2 = pnand %p481_p1, %p480_p0  ;;  %p486_p5 = scmp.lt.u32.totalorder %s484_s4, %s479_s30 }
  0x18   : > { %p488_p8 = scmp.lt.u32.totalorder %s479_s30, %s658_s25 }
  0x19   : > { %p483_p3 = pneg %p482_p2  ;;  %p487_p7 = por %p486_p5, %p485_p4 }
  0x1b   : > { %p489_p10 = por %p488_p8, %p487_p7 }
  0x1d   : > { %p490_p9 = pnand %p489_p10, %p483_p3 }
  0x1f   : > { %493 = shalt.err (!%p490_p9)
}
  0x20   : > { %s494_s13 = scalar_lea.vmem %s666_s27, 1024  ;;  %s577_s14 = smov [#allocation2]  }
  0x21   : > { %p495_p0 = scmp.ne.s32.totalorder %s666_s27, %s494_s13  ;;  %s499_s16 = sshll.u32 %s577_s14, 4  ;;  %s500_s16 = int_to_ptr.vmem [resolvable:$false] %s499_s16 }
  0x22   : > { %s501_s20 = scalar_lea.vmem %s500_s16, 2048  ;;  %p502_p11 = scmp.lt.s32.totalorder %s666_s27, %s500_s16 }
  0x23   : > { %p497_p2 = pnand %p495_p0, %p481_p1  ;;  %p503_p4 = scmp.lt.s32.totalorder %s501_s20, %s494_s13 }
  0x25   : > { %p498_p12 = pneg %p497_p2  ;;  %p504_p5 = por %p503_p4, %p502_p11 }
  0x27   : > { %p505_p7 = pnand %p504_p5, %p498_p12 }
  0x29   : > { %508 = shalt.err (!%p505_p7)
}
  0x2a   : > { %s578_s21 = smov 128   ;;  %s579_s22 = smov 8  }
  0x2b   : > { %434 = dma.hbm_to_vmem [thread:$0]  (!%p662_p13), %s658_s25, 1024, %s666_s27, %s668_s29, %s578_s21, %s578_s21, %s579_s22  }
  0x2c   : > { %p414_p9 = scmp.ge.s32.totalorder %s575_s9, 1  ;;  %p107_p1 = scmp.lt.s32.totalorder %s575_s9, 3 }
  0x2e   : > { %p108_p3 = pnand %p414_p9, %p107_p1 }
  0x2f   : > { %s699_s23 = sand.u32 (!%p108_p3), 1, %s567_s7  }
  0x30   : > { %111 = sbr.rel (%p108_p3) target bundleno = 226 (0xe2), region = 24  ;;  %s415_s24 = sshll.u32 (!%p108_p3), %s699_s23, 6 }
  0x31   : > { %s114_s26 = scalar_lea.sflag (!%p108_p3), [#allocation3], %s699_s23  ;;  %s117_s30 = scalar_lea.vmem (!%p108_p3), [#allocation2], %s415_s24 }
  0x37   : > { %554 = dma.done.wait (%p638_p6), %s114_s26, 1024  }
  0x38   : > { %556 = vsyncadd (%p638_p6), %s114_s26, 4294966272  ;;  %v709_v0 = vld [vmem:[%s117_s30 + $0x10] sm:$0xff]  ;;  %v138_v1 = vld [vmem:[%s117_s30] sm:$0xff]  ;;  %s580_s25 = smov 1   ;;  %s581_s17 = smov 127   ;;  %vm178_vm0 = vcmask 7168  }
  0x39   : > { %158 = vrot.lane.b32.xlu1 %v709_v0, %s580_s25  ;;  %154 = vrot.lane.b32.xlu0 %v138_v1, %s580_s25  ;;  %v712_v2 = vld [vmem:[%s117_s30 + $0x18] sm:$0xff]  ;;  %v139_v3 = vld [vmem:[%s117_s30 + $0x8] sm:$0xff]  ;;  %vm219_vm1 = vcmask 121856   ;;  %vm277_vm2 = vcmask 1046528   ;;  %vm244_vm3 = vcmask 1040384   ;;  %vm310_vm4 = vcmask 130048  }
  0x3a   : > { %v715_v4 = vld [vmem:[%s117_s30 + $0x28] sm:$0xff]  ;;  %v717_v5 = vld [vmem:[%s117_s30 + $0x20] sm:$0xff]  ;;  %v721_v6 = vld [vmem:[%s117_s30 + $0x38] sm:$0xff]  ;;  %s759_s27 = scalar_lea.vmem [#allocation5], %s415_s24  ;;  %s426_s28 = sshll.u32 %s616_s10, 10 }
  0x3b   : > { %v723_v7 = vld [vmem:[%s117_s30 + $0x30] sm:$0xff]  ;;  %s334_s29 = sshll.u32 %s759_s27, 4  ;;  %s792_s10 = scalar_lea.hbm %s843_s1, %s426_s28  ;;  %s794_s29 = int_to_ptr.vmem [resolvable:$true] %s334_s29 }
  0x3c   : > { %s320_s4 = scalar_lea.sflag [#allocation4], %s699_s23  ;;  %s509_s5 = scalar_lea.vmem %s794_s29, 1024 }
  0x3d   : > { %160 = vrot.lane.b32.xlu1 %v712_v2, %s580_s25  ;;  %156 = vrot.lane.b32.xlu0 %v139_v3, %s580_s25  ;;  %p510_p6 = scmp.ne.s32.totalorder %s794_s29, %s509_s5  ;;  %p850_p11 = scmp.ne.s32.totalorder %s847_s18, 0 }
  0x3e   : > { %s582_s11 = smov [#allocation5]  }
  0x3f   : > { %p511_p12 = pnand %p510_p6, %p850_p11  ;;  %s513_s13 = sshll.u32 %s582_s11, 4  ;;  %s514_s13 = int_to_ptr.vmem [resolvable:$false] %s513_s13 }
  0x40   : > { %s515_s14 = scalar_lea.vmem %s514_s13, 2048  ;;  %p516_p8 = scmp.lt.s32.totalorder %s794_s29, %s514_s13 }
  0x41   : > { %164 = vrot.lane.b32.xlu1 %v715_v4, %s580_s25  ;;  %162 = vrot.lane.b32.xlu0 %v717_v5, %s580_s25  ;;  %p512_p13 = pneg %p511_p12  ;;  %p517_p10 = scmp.lt.s32.totalorder %s515_s14, %s509_s5 }
  0x43   : > { %p518_p0 = por %p517_p10, %p516_p8 }
  0x45   : > { %168 = vrot.lane.b32.xlu1 %v721_v6, %s580_s25  ;;  %166 = vrot.lane.b32.xlu0 %v723_v7, %s580_s25  ;;  %p519_p2 = pnand %p518_p0, %p512_p13 }
  0x49   : > { %197 = vrot.lane.b32.xlu1 %v139_v3, %s581_s17  ;;  %195 = vrot.lane.b32.xlu0 %v138_v1, %s581_s17 }
  0x4d   : > { %201 = vrot.lane.b32.xlu1 %v712_v2, %s581_s17  ;;  %199 = vrot.lane.b32.xlu0 %v709_v0, %s581_s17 }
  0x51   : > { %205 = vrot.lane.b32.xlu1 %v715_v4, %s581_s17  ;;  %203 = vrot.lane.b32.xlu0 %v717_v5, %s581_s17 }
  0x55   : > { %209 = vrot.lane.b32.xlu1 %v721_v6, %s581_s17  ;;  %207 = vrot.lane.b32.xlu0 %v723_v7, %s581_s17 }
  0xab   : > { %v159_v8 = vpop.permute.xlu1 %158  ;;  %v155_v9 = vpop.permute.xlu0 %154 }
  0xac   : > { %v179_v16 = vsel %vm178_vm0, -inf, %v155_v9  ;;  %v181_v24 = vsel %vm178_vm0, -inf, %v159_v8 }
  0xad   : > { %v187_v18 = vmax.f32 %v179_v16, %v138_v1  ;;  %v189_v36 = vmax.f32 %v181_v24, %v709_v0 }
  0xaf   : > { %v161_v10 = vpop.permute.xlu1 %160  ;;  %v157_v11 = vpop.permute.xlu0 %156 }
  0xb0   : > { %v180_v17 = vsel %vm178_vm0, -inf, %v157_v11  ;;  %v182_v25 = vsel %vm178_vm0, -inf, %v161_v10 }
  0xb1   : > { %v188_v19 = vmax.f32 %v180_v17, %v139_v3  ;;  %v190_v37 = vmax.f32 %v182_v25, %v712_v2 }
  0xb3   : > { %v165_v12 = vpop.permute.xlu1 %164  ;;  %v163_v13 = vpop.permute.xlu0 %162 }
  0xb4   : > { %v184_v28 = vsel %vm178_vm0, -inf, %v165_v12  ;;  %v183_v29 = vsel %vm178_vm0, -inf, %v163_v13 }
  0xb5   : > { %v192_v40 = vmax.f32 %v184_v28, %v715_v4  ;;  %v191_v41 = vmax.f32 %v183_v29, %v717_v5 }
  0xb7   : > { %v169_v14 = vpop.permute.xlu1 %168  ;;  %v167_v15 = vpop.permute.xlu0 %166 }
  0xb8   : > { %v186_v48 = vsel %vm178_vm0, -inf, %v169_v14  ;;  %v185_v49 = vsel %vm178_vm0, -inf, %v167_v15 }
  0xb9   : > { %v194_v62 = vmax.f32 %v186_v48, %v721_v6  ;;  %v193_v63 = vmax.f32 %v185_v49, %v723_v7 }
  0xbb   : > { %v198_v20 = vpop.permute.xlu1 %197  ;;  %v196_v21 = vpop.permute.xlu0 %195 }
  0xbc   : > { %v221_v22 = vsel %vm219_vm1, %v198_v20, -inf  ;;  %v220_v23 = vsel %vm219_vm1, %v196_v21, -inf }
  0xbd   : > { %v229_v26 = vmax.f32 %v188_v19, %v221_v22  ;;  %v228_v27 = vmax.f32 %v187_v18, %v220_v23 }
  0xbf   : > { %v246_v30 = vrot.slane %v229_v26, 7  ;;  %v279_v31 = vrot.slane %v229_v26, 1  ;;  %v245_v32 = vrot.slane %v228_v27, 7  ;;  %v278_v33 = vrot.slane %v228_v27, 1  ;;  %v202_v34 = vpop.permute.xlu1 %201  ;;  %v200_v35 = vpop.permute.xlu0 %199 }
  0xc0   : > { %v223_v38 = vsel %vm219_vm1, %v202_v34, -inf  ;;  %v222_v39 = vsel %vm219_vm1, %v200_v35, -inf }
  0xc1   : > { %v247_v42 = vsel %vm244_vm3, %v245_v32, %v246_v30  ;;  %v265_v43 = vsel %vm244_vm3, -inf, %v245_v32  ;;  %v231_v46 = vmax.f32 %v190_v37, %v223_v38  ;;  %v230_v47 = vmax.f32 %v189_v36, %v222_v39 }
  0xc2   : > { %v269_v44 = vmax.f32 %v265_v43, %v228_v27  ;;  %v270_v45 = vmax.f32 %v247_v42, %v229_v26  ;;  %v298_v50 = vsel %vm277_vm2, %v279_v31, -inf  ;;  %v280_v51 = vsel %vm277_vm2, %v278_v33, %v279_v31 }
  0xc3   : > { %v206_v52 = vpop.permute.xlu1 %205  ;;  %v204_v53 = vpop.permute.xlu0 %203  ;;  %v249_v56 = vrot.slane %v231_v46, 7  ;;  %v282_v57 = vrot.slane %v231_v46, 1  ;;  %v248_v58 = vrot.slane %v230_v47, 7  ;;  %v281_v59 = vrot.slane %v230_v47, 1 }
  0xc4   : > { %v302_v54 = vmax.f32 %v269_v44, %v280_v51  ;;  %v303_v55 = vmax.f32 %v270_v45, %v298_v50  ;;  %v225_v60 = vsel %vm219_vm1, %v206_v52, -inf  ;;  %v224_v61 = vsel %vm219_vm1, %v204_v53, -inf }
  0xc5   : > { %v233_v0 = vmax.f32 %v192_v40, %v225_v60  ;;  %v232_v1 = vmax.f32 %v191_v41, %v224_v61  ;;  %v299_v2 = vsel %vm277_vm2, %v282_v57, -inf  ;;  %v250_v3 = vsel %vm244_vm3, %v248_v58, %v249_v56 }
  0xc6   : > { %311 = vst.msk [vmem:[%s759_s27] sm:$0xff] %vm310_vm4, %v302_v54  ;;  %312 = vst.msk [vmem:[%s759_s27 + $0x8] sm:$0xff] %vm310_vm4, %v303_v55  ;;  %v266_v4 = vsel %vm244_vm3, -inf, %v248_v58  ;;  %v283_v5 = vsel %vm277_vm2, %v281_v59, %v282_v57  ;;  %v272_v9 = vmax.f32 %v250_v3, %v231_v46 }
  0xc7   : > { %v210_v6 = vpop.permute.xlu1 %209  ;;  %v208_v7 = vpop.permute.xlu0 %207  ;;  %v271_v8 = vmax.f32 %v266_v4, %v230_v47  ;;  %v252_v10 = vrot.slane %v233_v0, 7  ;;  %v285_v11 = vrot.slane %v233_v0, 1  ;;  %v251_v12 = vrot.slane %v232_v1, 7 }
  0xc8   : > { %v284_v13 = vrot.slane %v232_v1, 1  ;;  %v227_v14 = vsel %vm219_vm1, %v210_v6, -inf  ;;  %v226_v15 = vsel %vm219_vm1, %v208_v7, -inf  ;;  %v305_v17 = vmax.f32 %v272_v9, %v299_v2 }
  0xc9   : > { %v304_v16 = vmax.f32 %v271_v8, %v283_v5  ;;  %v235_v18 = vmax.f32 %v194_v62, %v227_v14  ;;  %v253_v19 = vsel %vm244_vm3, %v251_v12, %v252_v10  ;;  %v267_v20 = vsel %vm244_vm3, -inf, %v251_v12 }
  0xca   : > { %v234_v21 = vmax.f32 %v193_v63, %v226_v15  ;;  %314 = vst.msk [vmem:[%s759_s27 + $0x18] sm:$0xff] %vm310_vm4, %v305_v17  ;;  %v300_v22 = vsel %vm277_vm2, %v285_v11, -inf  ;;  %v273_v23 = vmax.f32 %v267_v20, %v232_v1  ;;  %v274_v24 = vmax.f32 %v253_v19, %v233_v0 }
  0xcb   : > { %313 = vst.msk [vmem:[%s759_s27 + $0x10] sm:$0xff] %vm310_vm4, %v304_v16  ;;  %v255_v25 = vrot.slane %v235_v18, 7  ;;  %v286_v26 = vsel %vm277_vm2, %v284_v13, %v285_v11  ;;  %v288_v27 = vrot.slane %v235_v18, 1 }
  0xcc   : > { %v254_v28 = vrot.slane %v234_v21, 7  ;;  %v287_v29 = vrot.slane %v234_v21, 1  ;;  %v306_v30 = vmax.f32 %v273_v23, %v286_v26  ;;  %v307_v31 = vmax.f32 %v274_v24, %v300_v22 }
  0xcd   : > { %v301_v36 = vsel %vm277_vm2, %v288_v27, -inf }
  0xce   : > { %v256_v32 = vsel %vm244_vm3, %v254_v28, %v255_v25  ;;  %v268_v33 = vsel %vm244_vm3, -inf, %v254_v28  ;;  %315 = vst.msk [vmem:[%s759_s27 + $0x20] sm:$0xff] %vm310_vm4, %v306_v30  ;;  %316 = vst.msk [vmem:[%s759_s27 + $0x28] sm:$0xff] %vm310_vm4, %v307_v31  ;;  %v289_v37 = vsel %vm277_vm2, %v287_v29, %v288_v27 }
  0xcf   : > { %v275_v34 = vmax.f32 %v268_v33, %v234_v21  ;;  %v276_v35 = vmax.f32 %v256_v32, %v235_v18 }
  0xd1   : > { %v308_v38 = vmax.f32 %v275_v34, %v289_v37  ;;  %v309_v39 = vmax.f32 %v276_v35, %v301_v36 }
  0xd3   : > { %317 = vst.msk [vmem:[%s759_s27 + $0x30] sm:$0xff] %vm310_vm4, %v308_v38  ;;  %318 = vst.msk [vmem:[%s759_s27 + $0x38] sm:$0xff] %vm310_vm4, %v309_v39 }
  0xd4   : > { %522 = shalt.err (!%p519_p2)
}
  0xd5   : > { %s523_s16 = scalar_lea.hbm %s792_s10, 1024  ;;  %s527_s22 = scalar_lea.hbm %s843_s1, 2048 }
  0xd6   : > { %p524_p4 = scmp.ne.s32.totalorder %s792_s10, %s523_s16  ;;  %p528_p9 = scmp.lt.u32.totalorder %s792_s10, %s843_s1 }
  0xd7   : > { %p529_p1 = scmp.lt.u32.totalorder %s527_s22, %s523_s16  ;;  %p531_p6 = scmp.lt.u32.totalorder %s523_s16, %s792_s10 }
  0xd8   : > { %p525_p5 = pnand %p524_p4, %p850_p11 }
  0xd9   : > { %p530_p3 = por %p529_p1, %p528_p9 }
  0xda   : > { %p526_p7 = pneg %p525_p5 }
  0xdb   : > { %p532_p12 = por %p531_p6, %p530_p3 }
  0xdd   : > { %p533_p13 = pnand %p532_p12, %p526_p7 }
  0xdf   : > { %536 = shalt.err (!%p533_p13)
}
  0xe0   : > { %s583_s30 = smov 128   ;;  %s584_s25 = smov 8  }
  0xe1   : > { %429 = dma.vmem_to_hbm [thread:$0]  (%p850_p11), %s794_s29, 1024, %s792_s10, %s320_s4, %s583_s30, %s583_s30, %s584_s25  }
  0xe2 PF: > { %s349_s17 = sand.u32 1, %s563_s6   ;;  %p851_p8 = scmp.ne.s32.totalorder %s848_s19, 0 }
  0xe3   : > { %p852_p10 = scmp.ge.s32.totalorder %s575_s9, 2  ;;  %s350_s27 = scalar_lea.sflag [#allocation4], %s349_s17 }
  0xe5   : > { %p436_p0 = pnand %p852_p10, %p851_p8 }
  0xe7   : > { %558 = dma.done.wait (!%p436_p0), %s350_s27, 1024  }
  0xe8   : > { %560 = vsyncadd (!%p436_p0), %s350_s27, 4294966272  ;;  %p14_p2 = scmp.ge.s32.totalorder %s620_s12, 4   ;;  %s853_s6 = smov %s567_s7 }
  0xe9   : > { %s854_s7 = smov %s571_s8  ;;  %s855_s8 = smov %s632_s15 }
  0xea   : > { %s856_s9 = smov %s620_s12  ;;  %16 = sbr.rel (!%p14_p2) target bundleno = 5 (0x5), region = 69 }
  0xf1   :  { %355 = vsyncpa [#allocation3], 1 }
  0xf2   :  { %357 = vsyncpa [#allocation3 + $0x1], 1 }
  0xf3   :  { %358 = vsyncpa [#allocation4], 1 }
  0xf4   :  { %360 = vsyncpa [#allocation4 + $0x1], 1 }

</bundles_post_ra>
